<compile_context>
chip_gen: v6e
topology: v6e:2x2x1
jax: 0.10.0
libtpu: 0.0.40
codegen_flags: <defaults>
</compile_context>

<pallas_src>
import functools

import jax
import jax.numpy as jnp
from jax.experimental import pallas as pl
from jax.experimental.pallas import tpu as pltpu

MIN_STD = 1e-4  # hulc Distribution default min std added after softplus


def _round_up(n: int, m: int) -> int:
    return (n + m - 1) // m * m


def _physical_vmem_bytes() -> int:
    try:
        return int(pltpu.get_tpu_info().vmem_capacity_bytes)
    except Exception:
        return 64 << 20  # conservative (v7x per-TC) fallback


# --------------------------------------------------------------------------
# Kernel
# --------------------------------------------------------------------------
def make_mlp_prior_kernel(n_inputs: int):
    """Fused forward: (split) Linear+ReLU x4 -> state Linear -> sliced softplus."""

    def kernel(*refs):
        x_refs = refs[:n_inputs]
        w1_refs = refs[n_inputs:2 * n_inputs]
        (b1_ref, w2_ref, b2_ref, w3_ref, b3_ref,
         w4_ref, b4_ref, ws_ref, bs_ref, out_ref) = refs[2 * n_inputs:]

        # ---- layer 1: fused "concat + Linear" as a sum of per-chunk matmuls.
        # Start the f32 accumulator from the bias row (broadcasts over rows).
        h = b1_ref[...]
        for x_ref, w_ref in zip(x_refs, w1_refs):
            h = h + jnp.dot(x_ref[...].astype(jnp.bfloat16), w_ref[...],
                            preferred_element_type=jnp.float32)
        h = jnp.maximum(h, 0.0)

        # ---- layers 2-4: Linear -> ReLU (bf16 MXU operands, f32 epilogue).
        for w_ref, b_ref in ((w2_ref, b2_ref), (w3_ref, b3_ref), (w4_ref, b4_ref)):
            h = jnp.maximum(
                jnp.dot(h.astype(jnp.bfloat16), w_ref[...],
                        preferred_element_type=jnp.float32) + b_ref[...],
                0.0)

        # ---- state head: one lane-dense [mean | raw_std] slab.
        s = jnp.dot(h.astype(jnp.bfloat16), ws_ref[...],
                    preferred_element_type=jnp.float32) + bs_ref[...]

        half = s.shape[-1] // 2  # = padded plan_features, a multiple of 128
        # Aligned static slices (128-lane boundary) -> two unmasked vst's;
        # softplus (stable form) + MIN_STD runs only on the std half.
        mean_half = s[:, :half]
        raw_std = s[:, half:]
        softplus = (jnp.log1p(jnp.exp(-jnp.abs(raw_std)))
                    + jnp.maximum(raw_std, 0.0) + MIN_STD)
        out_ref[:, :half] = mean_half.astype(out_ref.dtype)
        out_ref[:, half:] = softplus.astype(out_ref.dtype)

    return kernel


# --------------------------------------------------------------------------
# Parameter packing (done once, outside the per-call path)
# --------------------------------------------------------------------------
def pack_params(params, perceptual_features, latent_goal_features,
                *, use_goal_in_prior=True, use_state_in_prior=True):
    """Split w1 per input, zero-pad hidden/state dims, cast weights to bf16."""
    hidden = int(params["b1"].shape[0])
    pf = int(params["ws"].shape[-1]) // 2
    h_pad = _round_up(hidden, 128)
    pf_pad = _round_up(pf, 128)

    def pad_to(a, shape):
        return jnp.pad(a, [(0, t - s) for s, t in zip(a.shape, shape)])

    feats = []
    if use_state_in_prior:
        feats.append(perceptual_features)
    if use_goal_in_prior:
        feats.append(latent_goal_features)
    if not feats:
        raise ValueError("at least one of goal/state must be used")

    # Split the first-layer weight to match the (state, goal) input chunks so
    # the wrapper never materializes a concatenated activation in HBM.
    w1 = params["w1"]
    w1_chunks, off = [], 0
    for f in feats:
        w1_chunks.append(
            pad_to(w1[off:off + f, :], (f, h_pad)).astype(jnp.bfloat16))
        off += f

    b1 = pad_to(params["b1"][None, :], (1, h_pad)).astype(jnp.float32)
    w234 = [pad_to(params[f"w{i}"], (h_pad, h_pad)).astype(jnp.bfloat16)
            for i in (2, 3, 4)]
    b234 = [pad_to(params[f"b{i}"][None, :], (1, h_pad)).astype(jnp.float32)
            for i in (2, 3, 4)]

    # State head laid out lane-dense: mean cols at [0, pf), std cols at
    # [pf_pad, pf_pad + pf); padded columns carry zero weights/biases.
    ws, bs = params["ws"], params["bs"]
    ws_pad = jnp.zeros((h_pad, 2 * pf_pad), jnp.float32)
    ws_pad = ws_pad.at[:hidden, :pf].set(ws[:, :pf])
    ws_pad = ws_pad.at[:hidden, pf_pad:pf_pad + pf].set(ws[:, pf:])
    bs_pad = jnp.zeros((1, 2 * pf_pad), jnp.float32)
    bs_pad = bs_pad.at[0, :pf].set(bs[:pf])
    bs_pad = bs_pad.at[0, pf_pad:pf_pad + pf].set(bs[pf:])

    packed_weights = tuple(w1_chunks) + (b1,
                                         w234[0], b234[0],
                                         w234[1], b234[1],
                                         w234[2], b234[2],
                                         ws_pad.astype(jnp.bfloat16),
                                         bs_pad)
    meta = dict(feats=tuple(feats), hidden_pad=h_pad,
                plan_features=pf, pf_pad=pf_pad,
                use_goal=use_goal_in_prior, use_state=use_state_in_prior)
    return packed_weights, meta


# --------------------------------------------------------------------------
# Batch tiling policy
# --------------------------------------------------------------------------
def _pick_batch_tile(b8: int, vmem_cap: int) -> int:
    """Largest tile from {512,...,8} that keeps padding waste small.

    512-row tiles only on 128-MiB VMEM parts (v5e/v6e); 256 cap on v7x so the
    activation/output buffers don't eat the headroom needed for resident
    weights. Falls back to 8 (always zero waste since b8 % 8 == 0).
    """
    tb_cap = 512 if vmem_cap >= (100 << 20) else 256
    for tb in (512, 256, 128, 64, 32, 16, 8):
        if tb > tb_cap:
            continue
        waste = _round_up(b8, tb) - b8
        if waste <= max(8, b8 // 8):  # <= ~12.5% padded rows
            return tb
    return 8


# --------------------------------------------------------------------------
# Forward wrapper
# --------------------------------------------------------------------------
def mlp_prior_forward(initial_percep_emb, latent_goal, packed_weights, meta):
    inputs = []
    if meta["use_state"]:
        inputs.append(initial_percep_emb)
    if meta["use_goal"]:
        inputs.append(latent_goal)

    batch = inputs[0].shape[0]
    pf, pf_pad, h_pad = meta["plan_features"], meta["pf_pad"], meta["hidden_pad"]

    vmem_cap = _physical_vmem_bytes()

    b8 = _round_up(batch, 8)
    tb = _pick_batch_tile(b8, vmem_cap)
    b_pad = _round_up(b8, tb)
    if b_pad != batch:
        inputs = [jnp.pad(x, ((0, b_pad - batch), (0, 0))) for x in inputs]

    n_in = len(inputs)
    io_map = lambda i: (i, 0)
    const_map = lambda i: (0, 0)

    # Activations/outputs: batch-tiled, default double-buffered pipelining.
    in_specs = [pl.BlockSpec((tb, x.shape[1]), io_map) for x in inputs]
    # Weights/biases: constant block index -> fetched once; single buffer so
    # the resident weight set doesn't pay the 2x double-buffer VMEM tax.
    in_specs += [pl.BlockSpec(w.shape, const_map, pipeline_mode=pl.Buffered(1))
                 for w in packed_weights]
    out_spec = pl.BlockSpec((tb, 2 * pf_pad), io_map)

    # --- explicit VMEM budget: weights(x1) + 2x input tiles + 2x output tile
    #     + per-layer activation temporaries, with headroom; clamp to ~75% of
    #     physical VMEM (leaves room for compiler-internal scratch/spills).
    weight_bytes = sum(int(w.size) * w.dtype.itemsize for w in packed_weights)
    in_tile_bytes = 2 * sum(tb * int(x.shape[1]) * x.dtype.itemsize for x in inputs)
    out_tile_bytes = 2 * tb * 2 * pf_pad * 4
    act_bytes = 4 * tb * h_pad * 4  # a few f32/bf16 per-layer temporaries
    vmem_needed = weight_bytes + in_tile_bytes + out_tile_bytes + act_bytes
    vmem_budget = max(int(vmem_needed * 1.3) + (2 << 20), 32 << 20)
    vmem_budget = min(vmem_budget, int(vmem_cap * 0.75))

    grid_steps = b_pad // tb
    # Tiny grids: keep on one TC so both v7x cores don't each DMA the full
    # weight set (small-batch regime is weight-HBM-bound).
    semantics = ("parallel",) if grid_steps > 2 else ("arbitrary",)

    fin = sum(meta["feats"])
    flops = 2 * b_pad * (fin * h_pad + 3 * h_pad * h_pad + h_pad * 2 * pf_pad)
    transcendentals = 2 * b_pad * pf_pad  # exp + log1p on the std half only
    bytes_accessed = (sum(int(x.size) * x.dtype.itemsize for x in inputs)
                      + weight_bytes
                      + b_pad * 2 * pf_pad * 4)

    out = pl.pallas_call(
        make_mlp_prior_kernel(n_in),
        grid=(grid_steps,),
        in_specs=in_specs,
        out_specs=out_spec,
        out_shape=jax.ShapeDtypeStruct((b_pad, 2 * pf_pad), jnp.float32),
        compiler_params=pltpu.CompilerParams(
            dimension_semantics=semantics,
            vmem_limit_bytes=int(vmem_budget)),
        cost_estimate=pl.CostEstimate(
            flops=int(flops),
            transcendentals=int(transcendentals),
            bytes_accessed=int(bytes_accessed)),
    )(*inputs, *packed_weights)

    mean = out[:batch, :pf]
    std = out[:batch, pf_pad:pf_pad + pf]
    return mean, std


# --------------------------------------------------------------------------
# Synthetic params + pure-JAX reference
# --------------------------------------------------------------------------
def init_params(key, in_features, hidden_size, plan_features):
    keys = jax.random.split(key, 10)

    def linear(kw, kb, fan_in, fan_out):
        bound = 1.0 / jnp.sqrt(fan_in)
        w = jax.random.uniform(kw, (fan_in, fan_out), jnp.float32, -bound, bound)
        b = jax.random.uniform(kb, (fan_out,), jnp.float32, -bound, bound)
        return w, b

    p = {}
    p["w1"], p["b1"] = linear(keys[0], keys[1], in_features, hidden_size)
    p["w2"], p["b2"] = linear(keys[2], keys[3], hidden_size, hidden_size)
    p["w3"], p["b3"] = linear(keys[4], keys[5], hidden_size, hidden_size)
    p["w4"], p["b4"] = linear(keys[6], keys[7], hidden_size, hidden_size)
    p["ws"], p["bs"] = linear(keys[8], keys[9], hidden_size, 2 * plan_features)
    return p


def reference_forward(initial_percep_emb, latent_goal, params):
    x = jnp.concatenate([initial_percep_emb, latent_goal], axis=-1)
    for i in (1, 2, 3, 4):
        x = jnp.maximum(x @ params[f"w{i}"] + params[f"b{i}"], 0.0)
    s = x @ params["ws"] + params["bs"]
    pf = params["ws"].shape[-1] // 2
    mean, raw_std = s[:, :pf], s[:, pf:]
    std = jax.nn.softplus(raw_std) + MIN_STD
    return mean, std


# --------------------------------------------------------------------------
if __name__ == "__main__":
    batch = 8
    perceptual_features = 16
    latent_goal_features = 16
    hidden_size = 32
    plan_features = 8
    in_features = perceptual_features + latent_goal_features  # use_goal & use_state

    key = jax.random.PRNGKey(0)
    k_p, k_g, k_w = jax.random.split(key, 3)
    initial_percep_emb = jax.random.normal(k_p, (batch, perceptual_features), jnp.float32)
    latent_goal = jax.random.normal(k_g, (batch, latent_goal_features), jnp.float32)
    params = init_params(k_w, in_features, hidden_size, plan_features)

    packed_weights, meta = pack_params(
        params, perceptual_features, latent_goal_features,
        use_goal_in_prior=True, use_state_in_prior=True)

    fwd = jax.jit(functools.partial(mlp_prior_forward, meta=meta))
    mean, std = fwd(initial_percep_emb, latent_goal, packed_weights)
    jax.block_until_ready((mean, std))

    ref_mean, ref_std = reference_forward(initial_percep_emb, latent_goal, params)
    assert mean.shape == (batch, plan_features) and std.shape == (batch, plan_features)
    # bf16 MXU operands -> looser tolerance vs the f32 reference.
    assert jnp.allclose(mean, ref_mean, atol=3e-2, rtol=3e-2)
    assert jnp.allclose(std, ref_std, atol=3e-2, rtol=3e-2)
    assert bool(jnp.all(std > 0.0))

    # TODO(synk): the abstract `dist` is assumed to be the hulc-style continuous
    # Gaussian (Linear(hidden, 2*plan_features) + softplus std); returning a
    # torch.distributions.Independent(Normal) object has no Pallas equivalent,
    # so the (mean, std) parameters are returned instead.
    print("KERNEL_OK")
</pallas_src>

<mosaic_0001>
module attributes {stable_mosaic.version = 11 : i64} {
  func.func @kernel(%arg0: i32, %arg1: memref<16x16xf32, #tpu.memory_space<vmem>>, %arg2: memref<16x16xf32, #tpu.memory_space<vmem>>, %arg3: memref<16x128xbf16, #tpu.memory_space<vmem>>, %arg4: memref<16x128xbf16, #tpu.memory_space<vmem>>, %arg5: memref<1x128xf32, #tpu.memory_space<vmem>>, %arg6: memref<128x128xbf16, #tpu.memory_space<vmem>>, %arg7: memref<1x128xf32, #tpu.memory_space<vmem>>, %arg8: memref<128x128xbf16, #tpu.memory_space<vmem>>, %arg9: memref<1x128xf32, #tpu.memory_space<vmem>>, %arg10: memref<128x128xbf16, #tpu.memory_space<vmem>>, %arg11: memref<1x128xf32, #tpu.memory_space<vmem>>, %arg12: memref<128x256xbf16, #tpu.memory_space<vmem>>, %arg13: memref<1x256xf32, #tpu.memory_space<vmem>>, %arg14: memref<16x256xf32, #tpu.memory_space<vmem>>) attributes {dimension_semantics = [#tpu.dimension_semantics<arbitrary>], iteration_bounds = array<i64: 1>, scalar_prefetch = 0 : i64, scratch_operands = 0 : i64, tpu.core_type = #tpu.core_type<tc>, window_params = [{transform_indices = @transform_0, window_bounds = array<i64: 16, 16>}, {transform_indices = @transform_1, window_bounds = array<i64: 16, 16>}, {pipeline_mode = #tpu.pipeline_mode<synchronous>, transform_indices = @transform_2, window_bounds = array<i64: 16, 128>}, {pipeline_mode = #tpu.pipeline_mode<synchronous>, transform_indices = @transform_3, window_bounds = array<i64: 16, 128>}, {pipeline_mode = #tpu.pipeline_mode<synchronous>, transform_indices = @transform_4, window_bounds = array<i64: 1, 128>}, {pipeline_mode = #tpu.pipeline_mode<synchronous>, transform_indices = @transform_5, window_bounds = array<i64: 128, 128>}, {pipeline_mode = #tpu.pipeline_mode<synchronous>, transform_indices = @transform_6, window_bounds = array<i64: 1, 128>}, {pipeline_mode = #tpu.pipeline_mode<synchronous>, transform_indices = @transform_7, window_bounds = array<i64: 128, 128>}, {pipeline_mode = #tpu.pipeline_mode<synchronous>, transform_indices = @transform_8, window_bounds = array<i64: 1, 128>}, {pipeline_mode = #tpu.pipeline_mode<synchronous>, transform_indices = @transform_9, window_bounds = array<i64: 128, 128>}, {pipeline_mode = #tpu.pipeline_mode<synchronous>, transform_indices = @transform_10, window_bounds = array<i64: 1, 128>}, {pipeline_mode = #tpu.pipeline_mode<synchronous>, transform_indices = @transform_11, window_bounds = array<i64: 128, 256>}, {pipeline_mode = #tpu.pipeline_mode<synchronous>, transform_indices = @transform_12, window_bounds = array<i64: 1, 256>}, {transform_indices = @transform_13, window_bounds = array<i64: 16, 256>}]} {
    %c0 = arith.constant 0 : index
    %c0_0 = arith.constant 0 : index
    %0 = vector.load %arg5[%c0, %c0_0] : memref<1x128xf32, #tpu.memory_space<vmem>>, vector<1x128xf32>
    %c0_1 = arith.constant 0 : index
    %c0_2 = arith.constant 0 : index
    %1 = vector.load %arg1[%c0_1, %c0_2] : memref<16x16xf32, #tpu.memory_space<vmem>>, vector<16x16xf32>
    %2 = arith.truncf %1 : vector<16x16xf32> to vector<16x16xbf16>
    %c0_3 = arith.constant 0 : index
    %c0_4 = arith.constant 0 : index
    %3 = vector.load %arg3[%c0_3, %c0_4] : memref<16x128xbf16, #tpu.memory_space<vmem>>, vector<16x128xbf16>
    %cst = arith.constant dense<0.000000e+00> : vector<16x128xf32>
    %4 = tpu.matmul %2, %3, %cst {dimension_numbers = #tpu.dot_dimension_numbers<[1], [0], [0], [1], [0, 0, 1, 1], [], []>} : vector<16x16xbf16>, vector<16x128xbf16>, vector<16x128xf32> -> vector<16x128xf32>
    %5 = vector.broadcast %0 : vector<1x128xf32> to vector<16x128xf32>
    %6 = arith.addf %5, %4 : vector<16x128xf32>
    %c0_5 = arith.constant 0 : index
    %c0_6 = arith.constant 0 : index
    %7 = vector.load %arg2[%c0_5, %c0_6] : memref<16x16xf32, #tpu.memory_space<vmem>>, vector<16x16xf32>
    %8 = arith.truncf %7 : vector<16x16xf32> to vector<16x16xbf16>
    %c0_7 = arith.constant 0 : index
    %c0_8 = arith.constant 0 : index
    %9 = vector.load %arg4[%c0_7, %c0_8] : memref<16x128xbf16, #tpu.memory_space<vmem>>, vector<16x128xbf16>
    %cst_9 = arith.constant dense<0.000000e+00> : vector<16x128xf32>
    %10 = tpu.matmul %8, %9, %cst_9 {dimension_numbers = #tpu.dot_dimension_numbers<[1], [0], [0], [1], [0, 0, 1, 1], [], []>} : vector<16x16xbf16>, vector<16x128xbf16>, vector<16x128xf32> -> vector<16x128xf32>
    %11 = arith.addf %6, %10 : vector<16x128xf32>
    %cst_10 = arith.constant 0.000000e+00 : f32
    %12 = vector.broadcast %cst_10 : f32 to vector<16x128xf32>
    %13 = arith.maximumf %11, %12 : vector<16x128xf32>
    %14 = arith.truncf %13 : vector<16x128xf32> to vector<16x128xbf16>
    %c0_11 = arith.constant 0 : index
    %c0_12 = arith.constant 0 : index
    %15 = vector.load %arg6[%c0_11, %c0_12] : memref<128x128xbf16, #tpu.memory_space<vmem>>, vector<128x128xbf16>
    %cst_13 = arith.constant dense<0.000000e+00> : vector<16x128xf32>
    %16 = tpu.matmul %14, %15, %cst_13 {dimension_numbers = #tpu.dot_dimension_numbers<[1], [0], [0], [1], [0, 0, 1, 1], [], []>} : vector<16x128xbf16>, vector<128x128xbf16>, vector<16x128xf32> -> vector<16x128xf32>
    %c0_14 = arith.constant 0 : index
    %c0_15 = arith.constant 0 : index
    %17 = vector.load %arg7[%c0_14, %c0_15] : memref<1x128xf32, #tpu.memory_space<vmem>>, vector<1x128xf32>
    %18 = vector.broadcast %17 : vector<1x128xf32> to vector<16x128xf32>
    %19 = arith.addf %16, %18 : vector<16x128xf32>
    %cst_16 = arith.constant 0.000000e+00 : f32
    %20 = vector.broadcast %cst_16 : f32 to vector<16x128xf32>
    %21 = arith.maximumf %19, %20 : vector<16x128xf32>
    %22 = arith.truncf %21 : vector<16x128xf32> to vector<16x128xbf16>
    %c0_17 = arith.constant 0 : index
    %c0_18 = arith.constant 0 : index
    %23 = vector.load %arg8[%c0_17, %c0_18] : memref<128x128xbf16, #tpu.memory_space<vmem>>, vector<128x128xbf16>
    %cst_19 = arith.constant dense<0.000000e+00> : vector<16x128xf32>
    %24 = tpu.matmul %22, %23, %cst_19 {dimension_numbers = #tpu.dot_dimension_numbers<[1], [0], [0], [1], [0, 0, 1, 1], [], []>} : vector<16x128xbf16>, vector<128x128xbf16>, vector<16x128xf32> -> vector<16x128xf32>
    %c0_20 = arith.constant 0 : index
    %c0_21 = arith.constant 0 : index
    %25 = vector.load %arg9[%c0_20, %c0_21] : memref<1x128xf32, #tpu.memory_space<vmem>>, vector<1x128xf32>
    %26 = vector.broadcast %25 : vector<1x128xf32> to vector<16x128xf32>
    %27 = arith.addf %24, %26 : vector<16x128xf32>
    %cst_22 = arith.constant 0.000000e+00 : f32
    %28 = vector.broadcast %cst_22 : f32 to vector<16x128xf32>
    %29 = arith.maximumf %27, %28 : vector<16x128xf32>
    %30 = arith.truncf %29 : vector<16x128xf32> to vector<16x128xbf16>
    %c0_23 = arith.constant 0 : index
    %c0_24 = arith.constant 0 : index
    %31 = vector.load %arg10[%c0_23, %c0_24] : memref<128x128xbf16, #tpu.memory_space<vmem>>, vector<128x128xbf16>
    %cst_25 = arith.constant dense<0.000000e+00> : vector<16x128xf32>
    %32 = tpu.matmul %30, %31, %cst_25 {dimension_numbers = #tpu.dot_dimension_numbers<[1], [0], [0], [1], [0, 0, 1, 1], [], []>} : vector<16x128xbf16>, vector<128x128xbf16>, vector<16x128xf32> -> vector<16x128xf32>
    %c0_26 = arith.constant 0 : index
    %c0_27 = arith.constant 0 : index
    %33 = vector.load %arg11[%c0_26, %c0_27] : memref<1x128xf32, #tpu.memory_space<vmem>>, vector<1x128xf32>
    %34 = vector.broadcast %33 : vector<1x128xf32> to vector<16x128xf32>
    %35 = arith.addf %32, %34 : vector<16x128xf32>
    %cst_28 = arith.constant 0.000000e+00 : f32
    %36 = vector.broadcast %cst_28 : f32 to vector<16x128xf32>
    %37 = arith.maximumf %35, %36 : vector<16x128xf32>
    %38 = arith.truncf %37 : vector<16x128xf32> to vector<16x128xbf16>
    %c0_29 = arith.constant 0 : index
    %c0_30 = arith.constant 0 : index
    %39 = vector.load %arg12[%c0_29, %c0_30] : memref<128x256xbf16, #tpu.memory_space<vmem>>, vector<128x256xbf16>
    %cst_31 = arith.constant dense<0.000000e+00> : vector<16x256xf32>
    %40 = tpu.matmul %38, %39, %cst_31 {dimension_numbers = #tpu.dot_dimension_numbers<[1], [0], [0], [1], [0, 0, 1, 1], [], []>} : vector<16x128xbf16>, vector<128x256xbf16>, vector<16x256xf32> -> vector<16x256xf32>
    %c0_32 = arith.constant 0 : index
    %c0_33 = arith.constant 0 : index
    %41 = vector.load %arg13[%c0_32, %c0_33] : memref<1x256xf32, #tpu.memory_space<vmem>>, vector<1x256xf32>
    %42 = vector.broadcast %41 : vector<1x256xf32> to vector<16x256xf32>
    %43 = arith.addf %40, %42 : vector<16x256xf32>
    %44 = vector.extract_strided_slice %43 {offsets = [0, 0], sizes = [16, 128], strides = [1, 1]} : vector<16x256xf32> to vector<16x128xf32>
    %45 = vector.extract_strided_slice %43 {offsets = [0, 128], sizes = [16, 128], strides = [1, 1]} : vector<16x256xf32> to vector<16x128xf32>
    %46 = math.absf %45 : vector<16x128xf32>
    %cst_34 = arith.constant 0.000000e+00 : f32
    %47 = vector.broadcast %cst_34 : f32 to vector<16x128xf32>
    %48 = arith.subf %47, %46 : vector<16x128xf32>
    %49 = math.exp %48 : vector<16x128xf32>
    %50 = math.log1p %49 : vector<16x128xf32>
    %cst_35 = arith.constant 0.000000e+00 : f32
    %51 = vector.broadcast %cst_35 : f32 to vector<16x128xf32>
    %52 = arith.maximumf %45, %51 : vector<16x128xf32>
    %53 = arith.addf %50, %52 : vector<16x128xf32>
    %cst_36 = arith.constant 9.99999974E-5 : f32
    %54 = vector.broadcast %cst_36 : f32 to vector<16x128xf32>
    %55 = arith.addf %53, %54 : vector<16x128xf32>
    %c0_37 = arith.constant 0 : index
    %c0_38 = arith.constant 0 : index
    %56 = vector.load %arg14[%c0_37, %c0_38] : memref<16x256xf32, #tpu.memory_space<vmem>>, vector<16x128xf32>
    tpu.vector_store %arg14[%c0_37, %c0_38], %44 {strides = array<i32>} : memref<16x256xf32, #tpu.memory_space<vmem>>, vector<16x128xf32>,
    %c0_39 = arith.constant 0 : index
    %c128 = arith.constant 128 : index
    %57 = vector.load %arg14[%c0_39, %c128] : memref<16x256xf32, #tpu.memory_space<vmem>>, vector<16x128xf32>
    tpu.vector_store %arg14[%c0_39, %c128], %55 {strides = array<i32>} : memref<16x256xf32, #tpu.memory_space<vmem>>, vector<16x128xf32>,
    return
  }
  func.func @transform_0(%arg0: i32) -> (i32, i32) {
    %c0_i32 = arith.constant 0 : i32
    %c0_i32_0 = arith.constant 0 : i32
    return %arg0, %c0_i32 : i32, i32
  }
  func.func @transform_1(%arg0: i32) -> (i32, i32) {
    %c0_i32 = arith.constant 0 : i32
    %c0_i32_0 = arith.constant 0 : i32
    return %arg0, %c0_i32 : i32, i32
  }
  func.func @transform_2(%arg0: i32) -> (i32, i32) {
    %c0_i32 = arith.constant 0 : i32
    %c0_i32_0 = arith.constant 0 : i32
    %c0_i32_1 = arith.constant 0 : i32
    return %c0_i32, %c0_i32_0 : i32, i32
  }
  func.func @transform_3(%arg0: i32) -> (i32, i32) {
    %c0_i32 = arith.constant 0 : i32
    %c0_i32_0 = arith.constant 0 : i32
    %c0_i32_1 = arith.constant 0 : i32
    return %c0_i32, %c0_i32_0 : i32, i32
  }
  func.func @transform_4(%arg0: i32) -> (i32, i32) {
    %c0_i32 = arith.constant 0 : i32
    %c0_i32_0 = arith.constant 0 : i32
    %c0_i32_1 = arith.constant 0 : i32
    return %c0_i32, %c0_i32_0 : i32, i32
  }
  func.func @transform_5(%arg0: i32) -> (i32, i32) {
    %c0_i32 = arith.constant 0 : i32
    %c0_i32_0 = arith.constant 0 : i32
    %c0_i32_1 = arith.constant 0 : i32
    return %c0_i32, %c0_i32_0 : i32, i32
  }
  func.func @transform_6(%arg0: i32) -> (i32, i32) {
    %c0_i32 = arith.constant 0 : i32
    %c0_i32_0 = arith.constant 0 : i32
    %c0_i32_1 = arith.constant 0 : i32
    return %c0_i32, %c0_i32_0 : i32, i32
  }
  func.func @transform_7(%arg0: i32) -> (i32, i32) {
    %c0_i32 = arith.constant 0 : i32
    %c0_i32_0 = arith.constant 0 : i32
    %c0_i32_1 = arith.constant 0 : i32
    return %c0_i32, %c0_i32_0 : i32, i32
  }
  func.func @transform_8(%arg0: i32) -> (i32, i32) {
    %c0_i32 = arith.constant 0 : i32
    %c0_i32_0 = arith.constant 0 : i32
    %c0_i32_1 = arith.constant 0 : i32
    return %c0_i32, %c0_i32_0 : i32, i32
  }
  func.func @transform_9(%arg0: i32) -> (i32, i32) {
    %c0_i32 = arith.constant 0 : i32
    %c0_i32_0 = arith.constant 0 : i32
    %c0_i32_1 = arith.constant 0 : i32
    return %c0_i32, %c0_i32_0 : i32, i32
  }
  func.func @transform_10(%arg0: i32) -> (i32, i32) {
    %c0_i32 = arith.constant 0 : i32
    %c0_i32_0 = arith.constant 0 : i32
    %c0_i32_1 = arith.constant 0 : i32
    return %c0_i32, %c0_i32_0 : i32, i32
  }
  func.func @transform_11(%arg0: i32) -> (i32, i32) {
    %c0_i32 = arith.constant 0 : i32
    %c0_i32_0 = arith.constant 0 : i32
    %c0_i32_1 = arith.constant 0 : i32
    return %c0_i32, %c0_i32_0 : i32, i32
  }
  func.func @transform_12(%arg0: i32) -> (i32, i32) {
    %c0_i32 = arith.constant 0 : i32
    %c0_i32_0 = arith.constant 0 : i32
    %c0_i32_1 = arith.constant 0 : i32
    return %c0_i32, %c0_i32_0 : i32, i32
  }
  func.func @transform_13(%arg0: i32) -> (i32, i32) {
    %c0_i32 = arith.constant 0 : i32
    %c0_i32_0 = arith.constant 0 : i32
    return %arg0, %c0_i32 : i32, i32
  }
}

</mosaic_0001>

<bundles_post_ra>
// kernel: mlp_prior_forward.1
= control target key start
LH: loop header
LB: loop body
LE: loop exit
PB: predicated region body
PF: predicated region fallthrough
CT: control target
= control target key end

     0   :  { %18 = vsyncpa [#allocation3], 0  ;;  %s1419_s0 = inlined_call_operand.vmem [shape: f32[16,16], index: 0, kind: input, shape index: {}]   ;;  %s1420_s1 = inlined_call_operand.vmem [shape: f32[16,16], index: 1, kind: input, shape index: {}]   ;;  %s1421_s2 = inlined_call_operand.hbm [shape: bf16[16,128], index: 2, kind: input, shape index: {}]   ;;  %s1422_s3 = inlined_call_operand.hbm [shape: bf16[16,128], index: 3, kind: input, shape index: {}]   ;;  %s1423_s4 = inlined_call_operand.hbm [shape: f32[1,128], index: 4, kind: input, shape index: {}]   ;;  %s1424_s5 = inlined_call_operand.hbm [shape: bf16[128,128], index: 5, kind: input, shape index: {}]   ;;  %s1425_s6 = inlined_call_operand.hbm [shape: f32[1,128], index: 6, kind: input, shape index: {}]   ;;  %s1426_s7 = inlined_call_operand.hbm [shape: bf16[128,128], index: 7, kind: input, shape index: {}]   ;;  %s1427_s8 = inlined_call_operand.hbm [shape: f32[1,128], index: 8, kind: input, shape index: {}]   ;;  %s1428_s9 = inlined_call_operand.vmem [shape: bf16[128,128], index: 9, kind: input, shape index: {}]   ;;  %s1429_s10 = inlined_call_operand.vmem [shape: f32[1,128], index: 10, kind: input, shape index: {}]   ;;  %s1430_s11 = inlined_call_operand.hbm [shape: bf16[128,256], index: 11, kind: input, shape index: {}]   ;;  %s1431_s12 = inlined_call_operand.vmem [shape: f32[1,256], index: 12, kind: input, shape index: {}]   ;;  %s1432_s13 = inlined_call_operand.vmem [shape: f32[16,256], index: 13, kind: output, shape index: {}]  }
   0x1   :  { %19 = vsyncpa [#allocation5], 0 }
   0x2   :  { %20 = vsyncpa [#allocation8], 0 }
   0x3   :  { %21 = vsyncpa [#allocation11], 0 }
   0x4   :  { %22 = vsyncpa [#allocation14], 0  ;;  %s1208_s25 = smov [#allocation4]   ;;  %s1209_s27 = smov [#allocation7]  }
   0x5   :  { %s44_s26 = sshll.u32 %s1208_s25, 4  ;;  %s66_s28 = sshll.u32 %s1209_s27, 4  ;;  %s45_s26 = int_to_ptr.vmem [resolvable:$true] %s44_s26  ;;  %s67_s28 = int_to_ptr.vmem [resolvable:$true] %s66_s28 }
   0x6   :  { %s1046_s29 = scalar_lea.vmem %s45_s26, 128  ;;  %p1051_p1 = scmp.lt.s32.totalorder %s45_s26, %s45_s26 }
   0x7   :  { %p1047_p0 = scmp.ne.s32.totalorder %s45_s26, %s1046_s29  ;;  %p1052_p2 = scmp.lt.s32.totalorder %s1046_s29, %s1046_s29 }
   0x9   :  { %p1053_p3 = por %p1052_p2, %p1051_p1 }
   0xb   :  { %p1054_p4 = pnand %p1053_p3, %p1047_p0 }
   0xd   :  { %1057 = shalt.err (!%p1054_p4)
}
   0xe   :  { %s1210_s30 = smov 64   ;;  %s1211_s14 = smov 4  }
   0xf   :  { %50 = dma.hbm_to_vmem [thread:$0]  %s1422_s3, 128, %s45_s26, [#allocation5], %s1210_s30, %s1210_s30, %s1211_s14  }
  0x10   :  { %s1066_s17 = scalar_lea.vmem %s67_s28, 1024  ;;  %p1071_p6 = scmp.lt.s32.totalorder %s67_s28, %s67_s28 }
  0x11   :  { %p1067_p5 = scmp.ne.s32.totalorder %s67_s28, %s1066_s17  ;;  %p1072_p7 = scmp.lt.s32.totalorder %s1066_s17, %s1066_s17 }
  0x13   :  { %p1073_p8 = por %p1072_p7, %p1071_p6 }
  0x15   :  { %p1074_p9 = pnand %p1073_p8, %p1067_p5 }
  0x17   :  { %1077 = shalt.err (!%p1074_p9)
}
  0x18   :  { %72 = dma.hbm_to_vmem [thread:$0]  %s1424_s5, 1024, %s67_s28, [#allocation8], %s1210_s30, %s1210_s30, %s1211_s14  }
  0x19   :  { %s1212_s20 = smov [#allocation10]   ;;  %s1213_s22 = smov [#allocation2]  }
  0x1a   :  { %s88_s21 = sshll.u32 %s1212_s20, 4  ;;  %s32_s23 = sshll.u32 %s1213_s22, 4  ;;  %s89_s21 = int_to_ptr.vmem [resolvable:$true] %s88_s21  ;;  %s33_s23 = int_to_ptr.vmem [resolvable:$true] %s32_s23 }
  0x1b   :  { %s1086_s3 = scalar_lea.vmem %s89_s21, 1024  ;;  %p1091_p11 = scmp.lt.s32.totalorder %s89_s21, %s89_s21 }
  0x1c   :  { %p1087_p10 = scmp.ne.s32.totalorder %s89_s21, %s1086_s3  ;;  %p1092_p12 = scmp.lt.s32.totalorder %s1086_s3, %s1086_s3 }
  0x1e   :  { %p1093_p13 = por %p1092_p12, %p1091_p11 }
  0x20   :  { %p1094_p0 = pnand %p1093_p13, %p1087_p10 }
  0x22   :  { %1097 = shalt.err (!%p1094_p0)
}
  0x23   :  { %94 = dma.hbm_to_vmem [thread:$0]  %s1426_s7, 1024, %s89_s21, [#allocation11], %s1210_s30, %s1210_s30, %s1211_s14  }
  0x24   :  { %s1106_s5 = scalar_lea.vmem %s33_s23, 128  ;;  %p1111_p2 = scmp.lt.s32.totalorder %s33_s23, %s33_s23 }
  0x25   :  { %p1107_p1 = scmp.ne.s32.totalorder %s33_s23, %s1106_s5  ;;  %p1112_p3 = scmp.lt.s32.totalorder %s1106_s5, %s1106_s5 }
  0x27   :  { %p1113_p4 = por %p1112_p3, %p1111_p2 }
  0x29   :  { %p1114_p5 = pnand %p1113_p4, %p1107_p1 }
  0x2b   :  { %1117 = shalt.err (!%p1114_p5)
}
  0x2c   :  { %38 = dma.hbm_to_vmem [thread:$0]  %s1421_s2, 128, %s33_s23, [#allocation3], %s1210_s30, %s1210_s30, %s1211_s14  }
  0x2d   :  { %s1214_s28 = smov [#allocation6]   ;;  %s1215_s15 = smov [#allocation9]  }
  0x2e   :  { %s57_s29 = sshll.u32 %s1214_s28, 4  ;;  %s79_s16 = sshll.u32 %s1215_s15, 4  ;;  %s58_s29 = int_to_ptr.vmem [resolvable:$true] %s57_s29  ;;  %s80_s16 = int_to_ptr.vmem [resolvable:$true] %s79_s16 }
  0x2f   :  { %s1126_s7 = scalar_lea.vmem %s58_s29, 16  ;;  %s1130_s17 = scalar_lea.vmem %s58_s29, 32 }
  0x30   :  { %p1127_p6 = scmp.ne.s32.totalorder %s58_s29, %s1126_s7  ;;  %p1131_p7 = scmp.lt.s32.totalorder %s58_s29, %s58_s29 }
  0x31   :  { %p1132_p8 = scmp.lt.s32.totalorder %s1130_s17, %s1126_s7 }
  0x33   :  { %p1133_p9 = por %p1132_p8, %p1131_p7 }
  0x35   :  { %p1134_p10 = pnand %p1133_p9, %p1127_p6 }
  0x37   :  { %1137 = shalt.err (!%p1134_p10)
}
  0x38   :  { %60 = dma.hbm_to_vmem [thread:$0]  %s1423_s4, 16, %s58_s29, [#allocation5]  }
  0x39   :  { %s1146_s20 = scalar_lea.vmem %s80_s16, 16  ;;  %s1150_s2 = scalar_lea.vmem %s80_s16, 32 }
  0x3a   :  { %p1147_p11 = scmp.ne.s32.totalorder %s80_s16, %s1146_s20  ;;  %p1151_p12 = scmp.lt.s32.totalorder %s80_s16, %s80_s16 }
  0x3b   :  { %p1152_p13 = scmp.lt.s32.totalorder %s1150_s2, %s1146_s20 }
  0x3d   :  { %p1153_p0 = por %p1152_p13, %p1151_p12 }
  0x3f   :  { %p1154_p1 = pnand %p1153_p0, %p1147_p11 }
  0x41   :  { %1157 = shalt.err (!%p1154_p1)
}
  0x42   :  { %82 = dma.hbm_to_vmem [thread:$0]  %s1425_s6, 16, %s80_s16, [#allocation8]  }
  0x43   :  { %s1216_s21 = smov [#allocation12]   ;;  %s1217_s23 = smov [#allocation13]  }
  0x44   :  { %s101_s22 = sshll.u32 %s1216_s21, 4  ;;  %s114_s3 = sshll.u32 %s1217_s23, 4  ;;  %s102_s22 = int_to_ptr.vmem [resolvable:$true] %s101_s22  ;;  %s115_s3 = int_to_ptr.vmem [resolvable:$true] %s114_s3 }
  0x45   :  { %s1166_s24 = scalar_lea.vmem %s102_s22, 16  ;;  %s1170_s4 = scalar_lea.vmem %s102_s22, 32 }
  0x46   :  { %p1167_p2 = scmp.ne.s32.totalorder %s102_s22, %s1166_s24  ;;  %p1171_p3 = scmp.lt.s32.totalorder %s102_s22, %s102_s22 }
  0x47   :  { %p1172_p4 = scmp.lt.s32.totalorder %s1170_s4, %s1166_s24 }
  0x49   :  { %p1173_p5 = por %p1172_p4, %p1171_p3 }
  0x4b   :  { %p1174_p6 = pnand %p1173_p5, %p1167_p2 }
  0x4d   :  { %1177 = shalt.err (!%p1174_p6)
}
  0x4e   :  { %104 = dma.hbm_to_vmem [thread:$0]  %s1427_s8, 16, %s102_s22, [#allocation11]  }
  0x4f   :  { %s1186_s26 = scalar_lea.vmem %s115_s3, 2048  ;;  %p1191_p8 = scmp.lt.s32.totalorder %s115_s3, %s115_s3 }
  0x50   :  { %p1187_p7 = scmp.ne.s32.totalorder %s115_s3, %s1186_s26  ;;  %p1192_p9 = scmp.lt.s32.totalorder %s1186_s26, %s1186_s26 }
  0x52   :  { %p1193_p10 = por %p1192_p9, %p1191_p8 }
  0x54   :  { %p1194_p11 = pnand %p1193_p10, %p1187_p7 }
  0x56   :  { %1197 = shalt.err (!%p1194_p11)
}
  0x57   :  { %s1218_s6 = smov 128   ;;  %s1219_s27 = smov 8  }
  0x58   :  { %120 = dma.hbm_to_vmem [thread:$0]  %s1430_s11, 2048, %s115_s3, [#allocation14], %s1218_s6, %s1218_s6, %s1219_s27  }
  0x59   :  { %1198 = dma.done.wait [#allocation3], 128  }
  0x5a   :  { %1199 = vsyncadd [#allocation3], 4294967168 }
  0x5b   :  { %1200 = dma.done.wait [#allocation5], 144  }
  0x5c   :  { %1201 = vsyncadd [#allocation5], 4294967152 }
  0x5d   :  { %1202 = dma.done.wait [#allocation8], 1040  }
  0x5e   :  { %1203 = vsyncadd [#allocation8], 4294966256 }
  0x5f   :  { %1204 = dma.done.wait [#allocation11], 1040  }
  0x60   :  { %1205 = vsyncadd [#allocation11], 4294966256 }
  0x61   :  { %1206 = dma.done.wait [#allocation14], 2048  }
  0x62   :  { %1207 = vsyncadd [#allocation14], 4294965248  ;;  %v1220_v0 = vmov 0.0   ;;  %vm1221_vm0 = vmmov 0   ;;  %v980_v1 = vld [vmem:[#allocation2] sm:$0xff]   ;;  %v981_v2 = vld [vmem:[#allocation4] sm:$0xff]  }
  0x63   :  { %893 = vmatprep.subr.bf16.mxu0 %v1220_v0  ;;  %899 = vmatprep.subr.bf16.mxu1 %v1220_v0  ;;  %v149_v3 = vld [vmem:[%s1419_s0] sm:$0xff]  ;;  %v150_v4 = vld [vmem:[%s1419_s0 + $0x8] sm:$0xff]  ;;  %vm160_vm1 = vcmask 130048   ;;  %v985_v12 = vld [vmem:[#allocation7 + $0x20] sm:$0xff]  }
  0x64   :  { %895 = vmatprep.mubr.msk.bf16.mxu0 %vm1221_vm0, %v1220_v0  ;;  %901 = vmatprep.mubr.msk.bf16.mxu1 %vm1221_vm0, %v1220_v0  ;;  %v213_v5 = vld [vmem:[%s1420_s1] sm:$0xff]  ;;  %v151_v6 = vpack.c.bf16 %v150_v4, %v149_v3  ;;  %v214_v7 = vld [vmem:[%s1420_s1 + $0x8] sm:$0xff]  ;;  %v989_v16 = vld [vmem:[#allocation7] sm:$0xff]  }
  0x65   :  { %894 = vmatpush3.bf16.msra.mxu0 %v980_v1  ;;  %900 = vmatpush3.bf16.msra.mxu1 %v981_v2  ;;  %v215_v8 = vpack.c.bf16 %v214_v7, %v213_v5  ;;  %v982_v9 = vld [vmem:[#allocation7 + $0x38] sm:$0xff]   ;;  %v983_v10 = vld [vmem:[#allocation7 + $0x30] sm:$0xff]   ;;  %v984_v11 = vld [vmem:[#allocation7 + $0x28] sm:$0xff]  }
  0x66   :  { %905 = vmatprep.subr.bf16.mxu0 %v1220_v0  ;;  %925 = vmatprep.subr.bf16.mxu1 %v1220_v0  ;;  %v986_v13 = vld [vmem:[#allocation7 + $0x18] sm:$0xff]   ;;  %v987_v14 = vld [vmem:[#allocation7 + $0x10] sm:$0xff]   ;;  %v988_v15 = vld [vmem:[#allocation7 + $0x8] sm:$0xff]  }
  0x67   :  { %v990_v17 = vld [vmem:[#allocation10 + $0x38] sm:$0xff]   ;;  %v991_v18 = vld [vmem:[#allocation10 + $0x30] sm:$0xff]   ;;  %v992_v19 = vld [vmem:[#allocation10 + $0x28] sm:$0xff]  }
  0x68   :  { %896 = vmatmul.mubr.msk.bf16.vlgmr.msra.gmra.mxu0 %vm160_vm1, %v151_v6  ;;  %902 = vmatmul.mubr.msk.bf16.vlgmr.msra.gmra.mxu1 %vm160_vm1, %v215_v8  ;;  %v993_v20 = vld [vmem:[#allocation10 + $0x20] sm:$0xff]   ;;  %v994_v21 = vld [vmem:[#allocation10 + $0x18] sm:$0xff]   ;;  %v995_v38 = vld [vmem:[#allocation10 + $0x10] sm:$0xff]  }
  0x69   :  { %906 = vmatpush3.bf16.msra.mxu0 %v982_v9  ;;  %921 = vmatprep.mubr.msk.bf16.mxu0 %vm1221_vm0, %v1220_v0  ;;  %v816_v22 = vld [vmem:[#allocation6] ss:$0 sm:$0xff]  ;;  %v996_v39 = vld [vmem:[#allocation10 + $0x8] sm:$0xff]   ;;  %v997_v40 = vld [vmem:[#allocation10] sm:$0xff]  }
  0x6a   :  { %907 = vmatprep.subr.bf16.mxu0 %v1220_v0  ;;  %941 = vmatprep.mubr.msk.bf16.mxu1 %vm1221_vm0, %v1220_v0  ;;  %v998_v41 = vld [vmem:[%s1428_s9 + $0x38] sm:$0xff]   ;;  %v999_v42 = vld [vmem:[%s1428_s9 + $0x30] sm:$0xff]   ;;  %v1000_v43 = vld [vmem:[%s1428_s9 + $0x28] sm:$0xff]  }
  0x6b   :  { %926 = vmatpush3.bf16.msra.mxu1 %v990_v17  ;;  %v1001_v44 = vld [vmem:[%s1428_s9 + $0x20] sm:$0xff]   ;;  %v1002_v45 = vld [vmem:[%s1428_s9 + $0x18] sm:$0xff]   ;;  %v819_v46 = vld [vmem:[#allocation9] ss:$0 sm:$0xff] }
  0x6c   :  { %927 = vmatprep.subr.bf16.mxu1 %v1220_v0  ;;  %v1003_v56 = vld [vmem:[%s1428_s9 + $0x10] sm:$0xff]   ;;  %v1004_v57 = vld [vmem:[%s1428_s9 + $0x8] sm:$0xff]   ;;  %v1005_v58 = vld [vmem:[%s1428_s9] sm:$0xff]  }
  0x6d   :  { %908 = vmatpush3.bf16.msra.mxu0 %v983_v10  ;;  %v1006_v59 = vld [vmem:[#allocation13 + $0x70] ss:$8 sps:$4 sm:$0xff]   ;;  %v1008_v60 = vld [vmem:[#allocation13 + $0x74] ss:$8 sps:$4 sm:$0xff]   ;;  %v1011_v61 = vld [vmem:[#allocation13 + $0x64] ss:$8 sps:$4 sm:$0xff]  }
  0x6e   :  { %909 = vmatprep.subr.bf16.mxu0 %v1220_v0  ;;  %v1009_v62 = vld [vmem:[#allocation13 + $0x60] ss:$8 sps:$4 sm:$0xff]   ;;  %v1014_v63 = vld [vmem:[#allocation13 + $0x54] ss:$8 sps:$4 sm:$0xff]   ;;  %v1012_v1 = vld [vmem:[#allocation13 + $0x50] ss:$8 sps:$4 sm:$0xff]  }
  0x6f   :  { %928 = vmatpush3.bf16.msra.mxu1 %v991_v18  ;;  %v1017_v2 = vld [vmem:[#allocation13 + $0x44] ss:$8 sps:$4 sm:$0xff]   ;;  %v1015_v3 = vld [vmem:[#allocation13 + $0x40] ss:$8 sps:$4 sm:$0xff]   ;;  %v1018_v4 = vld [vmem:[#allocation13 + $0x30] ss:$8 sps:$4 sm:$0xff]  }
  0x70   :  { %929 = vmatprep.subr.bf16.mxu1 %v1220_v0  ;;  %v1023_v5 = vld [vmem:[#allocation13 + $0x24] ss:$8 sps:$4 sm:$0xff]   ;;  %v1021_v6 = vld [vmem:[#allocation13 + $0x20] ss:$8 sps:$4 sm:$0xff]   ;;  %v828_v7 = vld [vmem:[#allocation12] ss:$0 sm:$0xff] }
  0x71   :  { %910 = vmatpush3.bf16.msra.mxu0 %v984_v11  ;;  %v1026_v17 = vld [vmem:[#allocation13 + $0x14] ss:$8 sps:$4 sm:$0xff]   ;;  %v1024_v18 = vld [vmem:[#allocation13 + $0x10] ss:$8 sps:$4 sm:$0xff]  }
  0x72   :  { %911 = vmatprep.subr.bf16.mxu0 %v1220_v0 }
  0x73   :  { %930 = vmatpush3.bf16.msra.mxu1 %v992_v19  ;;  %v1029_v19 = vld [vmem:[#allocation13 + $0x4] ss:$8 sps:$4 sm:$0xff]  }
  0x74   :  { %931 = vmatprep.subr.bf16.mxu1 %v1220_v0 }
  0x75   :  { %912 = vmatpush3.bf16.msra.mxu0 %v985_v12 }
  0x76   :  { %913 = vmatprep.subr.bf16.mxu0 %v1220_v0 }
  0x77   :  { %932 = vmatpush3.bf16.msra.mxu1 %v993_v20  ;;  %v1027_v20 = vld [vmem:[#allocation13] ss:$8 sps:$4 sm:$0xff]  }
  0x78   :  { %933 = vmatprep.subr.bf16.mxu1 %v1220_v0 }
  0x79   :  { %914 = vmatpush3.bf16.msra.mxu0 %v986_v13 }
  0x7a   :  { %915 = vmatprep.subr.bf16.mxu0 %v1220_v0 }
  0x7b   :  { %934 = vmatpush3.bf16.msra.mxu1 %v994_v21  ;;  %v1222_v21 = vmov 0  }
  0x7c   :  { %935 = vmatprep.subr.bf16.mxu1 %v1220_v0 }
  0x7d   :  { %916 = vmatpush3.bf16.msra.mxu0 %v987_v14 }
  0x7e   :  { %917 = vmatprep.subr.bf16.mxu0 %v1220_v0 }
  0x7f   :  { %936 = vmatpush3.bf16.msra.mxu1 %v995_v38 }
  0x80   :  { %937 = vmatprep.subr.bf16.mxu1 %v1220_v0 }
  0x81   :  { %918 = vmatpush3.bf16.msra.mxu0 %v988_v15 }
  0x82   :  { %919 = vmatprep.subr.bf16.mxu0 %v1220_v0 }
  0x83   :  { %938 = vmatpush3.bf16.msra.mxu1 %v996_v39 }
  0x84   :  { %939 = vmatprep.subr.bf16.mxu1 %v1220_v0 }
  0x85   :  { %920 = vmatpush3.bf16.msra.mxu0 %v989_v16 }
  0x86   :  { %945 = vmatprep.subr.bf16.mxu0 %v1220_v0 }
  0x87   :  { %940 = vmatpush3.bf16.msra.mxu1 %v997_v40 }
  0x88   :  { %726 = vmatprep.subr.bf16.mxu1 %v1008_v60 }
 0x128   :  { %v198_v23 = vpop.f32.mrf.mxu0  ;;  %v261_v25 = vpop.f32.mrf.mxu1 }
 0x129   :  { %v211_v24 = vadd.f32 %v816_v22, %v198_v23 }
 0x12a   :  { %v897_v26 = vpop.f32.mrf.mxu0  ;;  %v903_v27 = vpop.f32.mrf.mxu1 }
 0x12b   :  { %v268_v29 = vadd.f32 %v261_v25, %v211_v24 }
 0x12c   :  { %v201_v28 = vpop.f32.mrf.mxu0  ;;  %v264_v31 = vpop.f32.mrf.mxu1 }
 0x12d   :  { %v212_v30 = vadd.f32 %v816_v22, %v201_v28  ;;  %v270_v35 = vmax.f32 %v268_v29, 0.0  ;;  %v837_v22 = vld [vmem:[%s1429_s10] ss:$0 sm:$0xff] }
 0x12e   :  { %v898_v32 = vpop.f32.mrf.mxu0  ;;  %v904_v34 = vpop.f32.mrf.mxu1 }
 0x12f   :  { %v269_v33 = vadd.f32 %v264_v31, %v212_v30  ;;  %v636_v32 = vlaneseq }
 0x131   :  { %v271_v36 = vmax.f32 %v269_v33, 0.0  ;;  %v637_v33 = vshrl.u32 %v636_v32, 7 }
 0x133   :  { %v272_v37 = vpack.c.bf16 %v271_v36, %v270_v35  ;;  %v638_v34 = vsub.s32 0, %v637_v33  ;;  %v634_v35 = vld [vmem:[%s1431_s12] sm:$0x3]  ;;  %v642_v36 = vsub.s32 1, %v637_v33 }
 0x135   :  { %922 = vmatmul.mubr.bf16.vlgmr.msra.gmra.mxu0 %v272_v37  ;;  %v639_v37 = vrot.slane %v634_v35, %v638_v34  ;;  %v643_v38 = vrot.slane %v634_v35, %v642_v36 }
 0x136   :  { %961 = vmatprep.mubr.msk.bf16.mxu0 %vm1221_vm0, %v1220_v0  ;;  %946 = vmatpush3.bf16.msra.mxu0 %v998_v41 }
 0x137   :  { %947 = vmatprep.subr.bf16.mxu0 %v1220_v0 }
 0x13a   :  { %948 = vmatpush3.bf16.msra.mxu0 %v999_v42 }
 0x13b   :  { %949 = vmatprep.subr.bf16.mxu0 %v1220_v0 }
 0x13e   :  { %950 = vmatpush3.bf16.msra.mxu0 %v1000_v43 }
 0x13f   :  { %951 = vmatprep.subr.bf16.mxu0 %v1220_v0 }
 0x142   :  { %952 = vmatpush3.bf16.msra.mxu0 %v1001_v44 }
 0x143   :  { %953 = vmatprep.subr.bf16.mxu0 %v1220_v0 }
 0x146   :  { %954 = vmatpush3.bf16.msra.mxu0 %v1002_v45 }
 0x147   :  { %955 = vmatprep.subr.bf16.mxu0 %v1220_v0 }
 0x14a   :  { %956 = vmatpush3.bf16.msra.mxu0 %v1003_v56 }
 0x14b   :  { %957 = vmatprep.subr.bf16.mxu0 %v1220_v0 }
 0x14e   :  { %958 = vmatpush3.bf16.msra.mxu0 %v1004_v57 }
 0x14f   :  { %959 = vmatprep.subr.bf16.mxu0 %v1220_v0  ;;  %v1020_v0 = vld [vmem:[#allocation13 + $0x34] ss:$8 sps:$4 sm:$0xff]  }
 0x152   :  { %960 = vmatpush3.bf16.msra.mxu0 %v1005_v58 }
 0x1f5   :  { %v378_v47 = vpop.f32.mrf.mxu0 }
 0x1f6   :  { %v379_v49 = vadd.f32 %v819_v46, %v378_v47 }
 0x1f7   :  { %v923_v48 = vpop.f32.mrf.mxu0 }
 0x1f8   :  { %v385_v53 = vmax.f32 %v379_v49, 0.0 }
 0x1f9   :  { %v381_v50 = vpop.f32.mrf.mxu0 }
 0x1fa   :  { %v382_v51 = vadd.f32 %v819_v46, %v381_v50 }
 0x1fb   :  { %v924_v52 = vpop.f32.mrf.mxu0 }
 0x1fc   :  { %v386_v54 = vmax.f32 %v382_v51, 0.0 }
 0x1fe   :  { %v387_v55 = vpack.c.bf16 %v386_v54, %v385_v53 }
 0x200   :  { %942 = vmatmul.mubr.bf16.vlgmr.msra.gmra.mxu1 %v387_v55 }
 0x201   :  { %727 = vmatpush1.bf16.msra.mxu1 %v1006_v59  ;;  %758 = vmatprep.mubr.bf16.mxu1 %v1222_v21 }
 0x202   :  { %728 = vmatprep.subr.bf16.mxu1 %v1011_v61 }
 0x205   :  { %729 = vmatpush1.bf16.msra.mxu1 %v1009_v62 }
 0x206   :  { %730 = vmatprep.subr.bf16.mxu1 %v1014_v63 }
 0x209   :  { %731 = vmatpush1.bf16.msra.mxu1 %v1012_v1 }
 0x20a   :  { %732 = vmatprep.subr.bf16.mxu1 %v1017_v2 }
 0x20d   :  { %733 = vmatpush1.bf16.msra.mxu1 %v1015_v3 }
 0x20e   :  { %734 = vmatprep.subr.bf16.mxu1 %v1020_v0 }
 0x211   :  { %735 = vmatpush1.bf16.msra.mxu1 %v1018_v4 }
 0x212   :  { %736 = vmatprep.subr.bf16.mxu1 %v1023_v5 }
 0x215   :  { %737 = vmatpush1.bf16.msra.mxu1 %v1021_v6 }
 0x216   :  { %738 = vmatprep.subr.bf16.mxu1 %v1026_v17 }
 0x219   :  { %739 = vmatpush1.bf16.msra.mxu1 %v1024_v18 }
 0x21a   :  { %740 = vmatprep.subr.bf16.mxu1 %v1029_v19 }
 0x21d   :  { %741 = vmatpush1.bf16.msra.mxu1 %v1027_v20 }
 0x2c0   :  { %v493_v8 = vpop.f32.mrf.mxu1 }
 0x2c1   :  { %v494_v10 = vadd.f32 %v828_v7, %v493_v8 }
 0x2c2   :  { %v943_v9 = vpop.f32.mrf.mxu1 }
 0x2c3   :  { %v500_v14 = vmax.f32 %v494_v10, 0.0 }
 0x2c4   :  { %v496_v11 = vpop.f32.mrf.mxu1 }
 0x2c5   :  { %v497_v12 = vadd.f32 %v828_v7, %v496_v11 }
 0x2c6   :  { %v944_v13 = vpop.f32.mrf.mxu1 }
 0x2c7   :  { %v501_v15 = vmax.f32 %v497_v12, 0.0 }
 0x2c9   :  { %v502_v16 = vpack.c.bf16 %v501_v15, %v500_v14 }
 0x2cb   :  { %962 = vmatmul.mubr.bf16.vlgmr.msra.gmra.mxu0 %v502_v16 }
 0x38b   :  { %v608_v23 = vpop.f32.mrf.mxu0 }
 0x38c   :  { %v609_v25 = vadd.f32 %v837_v22, %v608_v23 }
 0x38d   :  { %v963_v24 = vpop.f32.mrf.mxu0 }
 0x38e   :  { %v615_v29 = vmax.f32 %v609_v25, 0.0 }
 0x38f   :  { %v611_v26 = vpop.f32.mrf.mxu0 }
 0x390   :  { %v612_v27 = vadd.f32 %v837_v22, %v611_v26 }
 0x391   :  { %v964_v28 = vpop.f32.mrf.mxu0 }
 0x392   :  { %v616_v30 = vmax.f32 %v612_v27, 0.0 }
 0x394   :  { %v617_v31 = vpack.c.bf16 %v616_v30, %v615_v29 }
 0x396   :  { %759 = vmatmul.mubr.bf16.vlgmr.msra.gmra.mxu1 %v617_v31 }
 0x456   :  { %v760_v39 = vpop.f32.mrf.mxu1 }
 0x457   :  { %v761_v40 = vadd.f32 %v760_v39, %v639_v37 }
 0x458   :  { %v762_v41 = vpop.f32.mrf.mxu1 }
 0x459   :  { %801 = vst [vmem:[%s1432_s13] sm:$0xff] %v761_v40  ;;  %v763_v42 = vadd.f32 %v762_v41, %v643_v38 }
 0x45a   :  { %v764_v43 = vpop.f32.mrf.mxu1 }
 0x45b   :  { %v769_v44 = vand.u32 2147483647, %v763_v42  ;;  %v765_v45 = vadd.f32 %v764_v43, %v639_v37  ;;  %v795_v2 = vmax.f32 %v763_v42, 0.0 }
 0x45c   :  { %v766_v46 = vpop.f32.mrf.mxu1 }
 0x45d   :  { %v771_v47 = vsub.f32 0.0, %v769_v44  ;;  %802 = vst [vmem:[%s1432_s13 + $0x10] sm:$0xff] %v765_v45  ;;  %v767_v48 = vadd.f32 %v766_v46, %v643_v38 }
 0x45f   :  { %v773_v49 = vmul.f32 1.442695, %v771_v47  ;;  %v770_v50 = vand.u32 2147483647, %v767_v48  ;;  %v796_v9 = vmax.f32 %v767_v48, 0.0 }
 0x461   :  { %1030 = vpow2.f32 %v773_v49  ;;  %v772_v51 = vsub.f32 0.0, %v770_v50 }
 0x463   :  { %v775_v52 = vmul.f32 1.442695, %v772_v51 }
 0x465   :  { %1032 = vpow2.f32 %v775_v52 }
 0x46e   :  { %v1031_v53 = vpop.eup %1030 }
 0x46f   :  { %v777_v54 = vadd.f32 1.0, %v1031_v53  ;;  %v780_v57 = vmul.f32 -0.5, %v1031_v53  ;;  %v783_v60 = vand.u32 2147483647, %v1031_v53 }
 0x471   :  { %1034 = vlog2.f32 %v777_v54  ;;  %v781_v58 = vadd.f32 1.0, %v780_v57  ;;  %vm784_vm2 = vcmp.lt.f32.partialorder %v783_v60, 0.0004427343 }
 0x472   :  { %v1033_v55 = vpop.eup %1032 }
 0x473   :  { %v786_v56 = vadd.f32 1.0, %v1033_v55  ;;  %v789_v59 = vmul.f32 -0.5, %v1033_v55  ;;  %v782_v63 = vmul.f32 %v1031_v53, %v781_v58  ;;  %v792_v3 = vand.u32 2147483647, %v1033_v55 }
 0x475   :  { %1036 = vlog2.f32 %v786_v56  ;;  %v790_v1 = vadd.f32 1.0, %v789_v59  ;;  %vm793_vm3 = vcmp.lt.f32.partialorder %v792_v3, 0.0004427343 }
 0x477   :  { %v791_v7 = vmul.f32 %v1033_v55, %v790_v1 }
 0x47e   :  { %v1035_v61 = vpop.eup %1034 }
 0x47f   :  { %v779_v62 = vmul.f32 0.6931472, %v1035_v61 }
 0x481   :  { %v785_v0 = vsel %vm784_vm2, %v782_v63, %v779_v62 }
 0x482   :  { %v1037_v4 = vpop.eup %1036  ;;  %v797_v5 = vadd.f32 %v795_v2, %v785_v0 }
 0x483   :  { %v788_v6 = vmul.f32 0.6931472, %v1037_v4 }
 0x484   :  { %v799_v8 = vadd.f32 0.0001, %v797_v5 }
 0x485   :  { %v794_v10 = vsel %vm793_vm3, %v791_v7, %v788_v6 }
 0x486   :  { %803 = vst [vmem:[%s1432_s13 + $0x8] sm:$0xff] %v799_v8  ;;  %v798_v11 = vadd.f32 %v796_v9, %v794_v10 }
 0x488   :  { %v800_v12 = vadd.f32 0.0001, %v798_v11 }
 0x48a   :  { %804 = vst [vmem:[%s1432_s13 + $0x18] sm:$0xff] %v800_v12 }
 0x48b   :  { %809 = vsyncpa [#allocation3], 1 }
 0x48c   :  { %810 = vsyncpa [#allocation5], 1 }
 0x48d   :  { %811 = vsyncpa [#allocation8], 1 }
 0x48e   :  { %812 = vsyncpa [#allocation11], 1 }
 0x48f   :  { %813 = vsyncpa [#allocation14], 1 }

</bundles_post_ra>
